<compile_context>
chip_gen: v7x
topology: tpu7x:2x2x1
jax: 0.10.0
libtpu: 0.0.40
codegen_flags: <defaults>
</compile_context>

<pallas_src>
import jax
import jax.numpy as jnp
from jax.experimental import pallas as pl
from jax.experimental.pallas import tpu as pltpu

# ---------------- configuration (small, lane/tile friendly) ----------------
B = 256              # total batch (2 grid steps of TILE_B)
TILE_B = 128         # batch rows per grid step (multiple of 8 sublanes / MXU M)
INPUT_DIM = 128      # lane-dense output width (multiple of 128)
HIDDEN_DIM = 32      # bottleneck
LEAKY_SLOPE = 0.01   # torch.nn.LeakyReLU default negative_slope


def _leaky_relu(x):
    return jnp.where(x > 0, x, LEAKY_SLOPE * x)


def dae_kernel(x_ref, w_enc_ref, b_enc_ref, w_dec_ref, b_dec_ref, out_ref):
    x = x_ref[...]                                                   # (TILE_B, D)

    # ---- encoder: Linear(input_dim, hidden_dim) + LeakyReLU ----
    h = jnp.dot(x, w_enc_ref[...], preferred_element_type=jnp.float32)
    encoded = _leaky_relu(h + b_enc_ref[...])                        # (TILE_B, H)

    # ---- decoder: Linear(hidden_dim, input_dim) + LeakyReLU ----
    d = jnp.dot(encoded, w_dec_ref[...], preferred_element_type=jnp.float32)
    out_ref[...] = _leaky_relu(d + b_dec_ref[...]).astype(out_ref.dtype)


def dae_forward(x, params):
    """decoded = decoder(encoder(x)); x is (B, INPUT_DIM) f32."""
    b, d = x.shape
    h = params["w_enc"].shape[1]
    assert b % TILE_B == 0

    return pl.pallas_call(
        dae_kernel,
        out_shape=jax.ShapeDtypeStruct((b, d), jnp.float32),
        grid=(b // TILE_B,),
        in_specs=[
            # x: tiled over the batch grid axis
            pl.BlockSpec((TILE_B, d), lambda i: (i, 0)),
            # weights / biases: whole array, constant index_map (resident in VMEM)
            pl.BlockSpec((d, h), lambda i: (0, 0)),
            pl.BlockSpec((1, h), lambda i: (0, 0)),
            pl.BlockSpec((h, d), lambda i: (0, 0)),
            pl.BlockSpec((1, d), lambda i: (0, 0)),
        ],
        out_specs=pl.BlockSpec((TILE_B, d), lambda i: (i, 0)),
        compiler_params=pltpu.CompilerParams(
            dimension_semantics=("parallel",),   # shard batch across TCs on v7x
        ),
    )(x, params["w_enc"], params["b_enc"], params["w_dec"], params["b_dec"])


def dae_reference(x, params):
    """Pure-JAX reference of the PyTorch forward (for correctness check)."""
    enc = _leaky_relu(x @ params["w_enc"] + params["b_enc"])
    return _leaky_relu(enc @ params["w_dec"] + params["b_dec"])


def init_params(key):
    """PyTorch nn.Linear-style init: U(-1/sqrt(fan_in), 1/sqrt(fan_in)).

    Weights are stored as (in_features, out_features) so y = x @ W + b
    (equivalent to torch's x @ W.T + b with W of shape (out, in)).
    """
    k1, k2, k3, k4 = jax.random.split(key, 4)

    def lin(kw, kb, fan_in, fan_out):
        bound = 1.0 / jnp.sqrt(jnp.float32(fan_in))
        w = jax.random.uniform(kw, (fan_in, fan_out), jnp.float32, -bound, bound)
        b = jax.random.uniform(kb, (1, fan_out), jnp.float32, -bound, bound)
        return w, b

    w_enc, b_enc = lin(k1, k2, INPUT_DIM, HIDDEN_DIM)   # encoder Linear
    w_dec, b_dec = lin(k3, k4, HIDDEN_DIM, INPUT_DIM)   # decoder Linear
    return dict(w_enc=w_enc, b_enc=b_enc, w_dec=w_dec, b_dec=b_dec)


if __name__ == "__main__":
    key = jax.random.PRNGKey(0)
    k_x, k_p = jax.random.split(key)
    x = jax.random.normal(k_x, (B, INPUT_DIM), jnp.float32)
    params = init_params(k_p)

    decoded = dae_forward(x, params)
    decoded = jax.block_until_ready(decoded)

    assert decoded.shape == (B, INPUT_DIM)
    ref = dae_reference(x, params)
    assert jnp.allclose(decoded, ref, atol=1e-5, rtol=1e-5), "mismatch vs pure-JAX reference"
    print("KERNEL_OK")
</pallas_src>

<mosaic_0001>
module attributes {stable_mosaic.version = 11 : i64} {
  func.func @dae_kernel(%arg0: i32, %arg1: memref<128x128xf32, #tpu.memory_space<vmem>>, %arg2: memref<128x32xf32, #tpu.memory_space<vmem>>, %arg3: memref<1x32xf32, #tpu.memory_space<vmem>>, %arg4: memref<32x128xf32, #tpu.memory_space<vmem>>, %arg5: memref<1x128xf32, #tpu.memory_space<vmem>>, %arg6: memref<128x128xf32, #tpu.memory_space<vmem>>) attributes {dimension_semantics = [#tpu.dimension_semantics<parallel>], iteration_bounds = array<i64: 2>, scalar_prefetch = 0 : i64, scratch_operands = 0 : i64, tpu.core_type = #tpu.core_type<tc>, window_params = [{transform_indices = @transform_0, window_bounds = array<i64: 128, 128>}, {pipeline_mode = #tpu.pipeline_mode<synchronous>, transform_indices = @transform_1, window_bounds = array<i64: 128, 32>}, {pipeline_mode = #tpu.pipeline_mode<synchronous>, transform_indices = @transform_2, window_bounds = array<i64: 1, 32>}, {pipeline_mode = #tpu.pipeline_mode<synchronous>, transform_indices = @transform_3, window_bounds = array<i64: 32, 128>}, {pipeline_mode = #tpu.pipeline_mode<synchronous>, transform_indices = @transform_4, window_bounds = array<i64: 1, 128>}, {transform_indices = @transform_5, window_bounds = array<i64: 128, 128>}]} {
    %c0 = arith.constant 0 : index
    %c0_0 = arith.constant 0 : index
    %0 = vector.load %arg1[%c0, %c0_0] : memref<128x128xf32, #tpu.memory_space<vmem>>, vector<128x128xf32>
    %c0_1 = arith.constant 0 : index
    %c0_2 = arith.constant 0 : index
    %1 = vector.load %arg2[%c0_1, %c0_2] : memref<128x32xf32, #tpu.memory_space<vmem>>, vector<128x32xf32>
    %cst = arith.constant dense<0.000000e+00> : vector<128x32xf32>
    %2 = tpu.matmul %0, %1, %cst {dimension_numbers = #tpu.dot_dimension_numbers<[1], [0], [0], [1], [0, 0, 1, 1], [], []>} : vector<128x128xf32>, vector<128x32xf32>, vector<128x32xf32> -> vector<128x32xf32>
    %c0_3 = arith.constant 0 : index
    %c0_4 = arith.constant 0 : index
    %3 = vector.load %arg3[%c0_3, %c0_4] : memref<1x32xf32, #tpu.memory_space<vmem>>, vector<1x32xf32>
    %4 = vector.broadcast %3 : vector<1x32xf32> to vector<128x32xf32>
    %5 = arith.addf %2, %4 : vector<128x32xf32>
    %cst_5 = arith.constant 0.000000e+00 : f32
    %6 = vector.broadcast %cst_5 : f32 to vector<128x32xf32>
    %7 = arith.cmpf ogt, %5, %6 : vector<128x32xf32>
    %cst_6 = arith.constant 0.00999999977 : f32
    %8 = vector.broadcast %cst_6 : f32 to vector<128x32xf32>
    %9 = arith.mulf %8, %5 : vector<128x32xf32>
    %10 = arith.select %7, %5, %9 : vector<128x32xi1>, vector<128x32xf32>
    %c0_7 = arith.constant 0 : index
    %c0_8 = arith.constant 0 : index
    %11 = vector.load %arg4[%c0_7, %c0_8] : memref<32x128xf32, #tpu.memory_space<vmem>>, vector<32x128xf32>
    %cst_9 = arith.constant dense<0.000000e+00> : vector<128x128xf32>
    %12 = tpu.matmul %10, %11, %cst_9 {dimension_numbers = #tpu.dot_dimension_numbers<[1], [0], [0], [1], [0, 0, 1, 1], [], []>} : vector<128x32xf32>, vector<32x128xf32>, vector<128x128xf32> -> vector<128x128xf32>
    %c0_10 = arith.constant 0 : index
    %c0_11 = arith.constant 0 : index
    %13 = vector.load %arg5[%c0_10, %c0_11] : memref<1x128xf32, #tpu.memory_space<vmem>>, vector<1x128xf32>
    %14 = vector.broadcast %13 : vector<1x128xf32> to vector<128x128xf32>
    %15 = arith.addf %12, %14 : vector<128x128xf32>
    %cst_12 = arith.constant 0.000000e+00 : f32
    %16 = vector.broadcast %cst_12 : f32 to vector<128x128xf32>
    %17 = arith.cmpf ogt, %15, %16 : vector<128x128xf32>
    %cst_13 = arith.constant 0.00999999977 : f32
    %18 = vector.broadcast %cst_13 : f32 to vector<128x128xf32>
    %19 = arith.mulf %18, %15 : vector<128x128xf32>
    %20 = arith.select %17, %15, %19 : vector<128x128xi1>, vector<128x128xf32>
    %c0_14 = arith.constant 0 : index
    %c0_15 = arith.constant 0 : index
    %21 = vector.load %arg6[%c0_14, %c0_15] : memref<128x128xf32, #tpu.memory_space<vmem>>, vector<128x128xf32>
    tpu.vector_store %arg6[%c0_14, %c0_15], %20 {strides = array<i32>} : memref<128x128xf32, #tpu.memory_space<vmem>>, vector<128x128xf32>,
    return
  }
  func.func @transform_0(%arg0: i32) -> (i32, i32) {
    %c0_i32 = arith.constant 0 : i32
    %c0_i32_0 = arith.constant 0 : i32
    return %arg0, %c0_i32 : i32, i32
  }
  func.func @transform_1(%arg0: i32) -> (i32, i32) {
    %c0_i32 = arith.constant 0 : i32
    %c0_i32_0 = arith.constant 0 : i32
    %c0_i32_1 = arith.constant 0 : i32
    return %c0_i32, %c0_i32_0 : i32, i32
  }
  func.func @transform_2(%arg0: i32) -> (i32, i32) {
    %c0_i32 = arith.constant 0 : i32
    %c0_i32_0 = arith.constant 0 : i32
    %c0_i32_1 = arith.constant 0 : i32
    return %c0_i32, %c0_i32_0 : i32, i32
  }
  func.func @transform_3(%arg0: i32) -> (i32, i32) {
    %c0_i32 = arith.constant 0 : i32
    %c0_i32_0 = arith.constant 0 : i32
    %c0_i32_1 = arith.constant 0 : i32
    return %c0_i32, %c0_i32_0 : i32, i32
  }
  func.func @transform_4(%arg0: i32) -> (i32, i32) {
    %c0_i32 = arith.constant 0 : i32
    %c0_i32_0 = arith.constant 0 : i32
    %c0_i32_1 = arith.constant 0 : i32
    return %c0_i32, %c0_i32_0 : i32, i32
  }
  func.func @transform_5(%arg0: i32) -> (i32, i32) {
    %c0_i32 = arith.constant 0 : i32
    %c0_i32_0 = arith.constant 0 : i32
    return %arg0, %c0_i32 : i32, i32
  }
}

</mosaic_0001>

<bundles_post_ra>
// kernel: tpu_custom_call.1
= control target key start
LH: loop header
LB: loop body
LE: loop exit
PB: predicated region body
PF: predicated region fallthrough
CT: control target
= control target key end

     0   :  { %10 = vsyncpa [#allocation3], 0  ;;  %s1552_s0 = inlined_call_operand.hbm [shape: f32[256,128], index: 0, kind: input, shape index: {}]   ;;  %s1553_s1 = inlined_call_operand.vmem [shape: f32[128,32], index: 1, kind: input, shape index: {}]   ;;  %s1554_s2 = inlined_call_operand.vmem [shape: f32[1,32], index: 2, kind: input, shape index: {}]   ;;  %s1555_s3 = inlined_call_operand.vmem [shape: f32[32,128], index: 3, kind: input, shape index: {}]   ;;  %s1556_s4 = inlined_call_operand.vmem [shape: f32[1,128], index: 4, kind: input, shape index: {}]   ;;  %s1557_s5 = inlined_call_operand.hbm [shape: f32[256,128], index: 5, kind: output, shape index: {}]  }
   0x1   :  { %12 = vsyncpa [#allocation3 + $0x1], 0 }
   0x2   :  { %13 = vsyncpa [#allocation4], 0 }
   0x3   :  { %15 = vsyncpa [#allocation4 + $0x1], 0  ;;  %s1231_s18 = smov 0   ;;  %s1233_s19 = smov 0  }
   0x4   :  { %s1235_s20 = smov 0   ;;  %s1237_s21 = smov 0  }
   0x5 LB: > { %s1252_s22 = sadd.s32 4294967295, %s1193_s21   ;;  %s833_s23 = sadd.s32 4294967294, %s1193_s21   ;;  %s1193_s21 = sphi %s1237_s21, %s1570_s21   ;;  %s1189_s20 = sphi %s1235_s20, %s1569_s20   ;;  %s1185_s19 = sphi %s1233_s19, %s1568_s19   ;;  %s1181_s18 = sphi %s1231_s18, %s1567_s18  }
   0x6   : > { %s1256_s24 = sadd.s32 1, %s1193_s21   ;;  %s28_s25 = sadd.s32 1, %s1189_s20 }
   0x7   : > { %s25_s26 = ssub.s32 %s1193_s21, %s1256_s24  ;;  %p35_p0 = scmp.ne.s32.totalorder %s1189_s20, %s1185_s19 }
   0x8   : > { %p26_p1 = scmp.eq.s32.totalorder %s25_s26, 0  ;;  %p36_p2 = scmp.eq.s32.totalorder %s1193_s21, 0 }
   0x9   : > { %p41_p3 = scmp.ne.s32.totalorder %s1185_s19, %s1181_s18  ;;  %p42_p4 = scmp.eq.s32.totalorder %s1252_s22, 0 }
   0xa   : > { %s1268_s27 = scalar_select %p26_p1, %s1189_s20, %s28_s25  }
   0xb   : > { %p1270_p5 = por %p36_p2, %p35_p0  ;;  %p1274_p6 = por %p42_p4, %p41_p3 }
   0xc   : > { %p149_p7 = scmp.eq.s32.totalorder %s1252_s22, 1  ;;  %p155_p8 = scmp.eq.s32.totalorder %s833_s23, 1 }
   0xd   : > { %p1059_p10 = scmp.lt.s32.totalorder %s1193_s21, 2  ;;  %s187_s7 = sand.u32 1, %s1189_s20  }
   0xe   : > { %p1281_p11 = por %p149_p7, %p35_p0  ;;  %p1285_p12 = por %p155_p8, %p41_p3 }
   0xf   : > { %s865_s8 = sshll.u32 %s1193_s21, 11  ;;  %s836_s9 = sshll.u32 %s187_s7, 7 }
  0x10   : > { %s1561_s30 = scalar_select %p1281_p11, 1, 0 }
  0x11   : > { %s1562_s6 = scalar_select %p1285_p12, 1, 0 }
  0x12   : > { %s1294_s12 = scalar_lea.hbm %s1552_s0, %s865_s8  ;;  %s191_s13 = scalar_lea.vmem [#allocation2], %s836_s9 }
  0x13   : > { %s198_s14 = sshll.u32 %s191_s13, 4  ;;  %p1298_p13 = pnand %p1059_p10, %p1270_p5  ;;  %s1302_s14 = int_to_ptr.vmem [resolvable:$true] %s198_s14 }
  0x14   : > { %s1304_s16 = scalar_lea.sflag [#allocation3], %s187_s7  ;;  %s1097_s17 = scalar_lea.hbm %s1294_s12, 2048 }
  0x15   : > { %p1098_p0 = scmp.ne.s32.totalorder %s1294_s12, %s1097_s17  ;;  %p1099_p1 = pneg %p1298_p13 }
  0x16   : > { %s1102_s26 = scalar_lea.hbm %s1552_s0, 4096  ;;  %p1103_p4 = scmp.lt.u32.totalorder %s1294_s12, %s1552_s0 }
  0x17   : > { %p1100_p2 = pnand %p1099_p1, %p1098_p0  ;;  %p1104_p5 = scmp.lt.u32.totalorder %s1102_s26, %s1097_s17 }
  0x18   : > { %p1106_p8 = scmp.lt.u32.totalorder %s1097_s17, %s1294_s12 }
  0x19   : > { %p1101_p3 = pneg %p1100_p2  ;;  %p1105_p7 = por %p1104_p5, %p1103_p4 }
  0x1b   : > { %p1107_p10 = por %p1106_p8, %p1105_p7 }
  0x1d   : > { %p1108_p9 = pnand %p1107_p10, %p1101_p3 }
  0x1f   : > { %1111 = shalt.err (!%p1108_p9)
}
  0x20   : > { %s1112_s7 = scalar_lea.vmem %s1302_s14, 2048  ;;  %s1195_s9 = smov [#allocation2]  }
  0x21   : > { %p1113_p0 = scmp.ne.s32.totalorder %s1302_s14, %s1112_s7  ;;  %s1117_s10 = sshll.u32 %s1195_s9, 4  ;;  %s1118_s10 = int_to_ptr.vmem [resolvable:$false] %s1117_s10 }
  0x22   : > { %s1119_s11 = scalar_lea.vmem %s1118_s10, 4096  ;;  %p1120_p11 = scmp.lt.s32.totalorder %s1302_s14, %s1118_s10 }
  0x23   : > { %p1115_p2 = pnand %p1113_p0, %p1099_p1  ;;  %p1121_p4 = scmp.lt.s32.totalorder %s1119_s11, %s1112_s7 }
  0x25   : > { %p1116_p12 = pneg %p1115_p2  ;;  %p1122_p5 = por %p1121_p4, %p1120_p11 }
  0x27   : > { %p1123_p7 = pnand %p1122_p5, %p1116_p12 }
  0x29   : > { %1126 = shalt.err (!%p1123_p7)
}
  0x2a   : > { %s1196_s13 = smov 128   ;;  %s1197_s17 = smov 8  }
  0x2b   : > { %1054 = dma.hbm_to_vmem [thread:$0]  (!%p1298_p13), %s1294_s12, 2048, %s1302_s14, %s1304_s16, %s1196_s13, %s1196_s13, %s1197_s17  }
  0x2c   : > { %p839_p9 = scmp.ge.s32.totalorder %s1193_s21, 1  ;;  %p206_p1 = scmp.lt.s32.totalorder %s1193_s21, 3 }
  0x2e   : > { %p207_p3 = pnand %p839_p9, %p206_p1 }
  0x2f   : > { %s1335_s23 = sand.u32 (!%p207_p3), 1, %s1185_s19  }
  0x30   : > { %210 = sbr.rel (%p207_p3) target bundleno = 571 (0x23b), region = 40  ;;  %s840_s25 = sshll.u32 (!%p207_p3), %s1335_s23, 7 }
  0x31   : > { %s213_s26 = scalar_lea.sflag (!%p207_p3), [#allocation3], %s1335_s23  ;;  %s1341_s28 = scalar_lea.vmem (!%p207_p3), [#allocation2], %s840_s25 }
  0x37   : > { %1172 = dma.done.wait (%p1274_p6), %s213_s26, 2048  }
  0x38   : > { %1174 = vsyncadd (%p1274_p6), %s213_s26, 4294965248  ;;  %v261_v0 = vld [vmem:[%s1553_s1] sm:$0xff]  ;;  %v262_v1 = vld [vmem:[%s1553_s1 + $0x8] sm:$0xff]  ;;  %vm488_vm2 = vcmask 261120   ;;  %s1470_s8 = scalar_lea.vmem [#allocation5], %s840_s25  ;;  %s866_s25 = sshll.u32 %s1252_s22, 11 }
  0x39   : > { %v263_v2 = vld [vmem:[%s1553_s1 + $0x10] sm:$0xff]  ;;  %v1007_v3 = vpack.c.bf16 %v262_v1, %v261_v0  ;;  %v264_v4 = vld [vmem:[%s1553_s1 + $0x18] sm:$0xff]  ;;  %v265_v6 = vld [vmem:[%s1553_s1 + $0x20] sm:$0xff]  ;;  %s760_s7 = sshll.u32 %s1470_s8, 4  ;;  %s1504_s29 = scalar_lea.hbm %s1557_s5, %s866_s25  ;;  %s1506_s7 = int_to_ptr.vmem [resolvable:$true] %s760_s7 }
  0x3a   : > { %v1011_v5 = vpack.c.bf16 %v264_v4, %v263_v2  ;;  %v266_v7 = vld [vmem:[%s1553_s1 + $0x28] sm:$0xff]  ;;  %v245_v9 = vld [vmem:[%s1341_s28] sm:$0xff]  ;;  %v267_v10 = vld [vmem:[%s1553_s1 + $0x30] sm:$0xff]  ;;  %s747_s22 = scalar_lea.sflag [#allocation4], %s1335_s23  ;;  %s1127_s11 = scalar_lea.vmem %s1506_s7, 2048 }
  0x3b   : > { %1008 = vmatprep.subr.bf16.mxu0 %v1007_v3  ;;  %v1015_v8 = vpack.c.bf16 %v266_v7, %v265_v6  ;;  %v268_v11 = vld [vmem:[%s1553_s1 + $0x38] sm:$0xff]  ;;  %951 = vmatprep.mubr.f32.mxu0 %v245_v9  ;;  %v269_v13 = vld [vmem:[%s1553_s1 + $0x40] sm:$0xff]  ;;  %v270_v14 = vld [vmem:[%s1553_s1 + $0x48] sm:$0xff]  ;;  %p1128_p6 = scmp.ne.s32.totalorder %s1506_s7, %s1127_s11  ;;  %p1564_p11 = scmp.ne.s32.totalorder %s1561_s30, 0 }
  0x3c   : > { %1010 = vmatpush3.bf16.msra.mxu0 %v1007_v3  ;;  %v1019_v12 = vpack.c.bf16 %v268_v11, %v267_v10  ;;  %v1023_v15 = vpack.c.bf16 %v270_v14, %v269_v13  ;;  %v271_v16 = vld [vmem:[%s1553_s1 + $0x50] sm:$0xff]  ;;  %v272_v17 = vld [vmem:[%s1553_s1 + $0x58] sm:$0xff]  ;;  %v273_v19 = vld [vmem:[%s1553_s1 + $0x60] sm:$0xff]  ;;  %s1198_s13 = smov [#allocation5]  }
  0x3d   : > { %1012 = vmatprep.subr.bf16.mxu0 %v1011_v5  ;;  %v1027_v18 = vpack.c.bf16 %v272_v17, %v271_v16  ;;  %v274_v20 = vld [vmem:[%s1553_s1 + $0x68] sm:$0xff]  ;;  %v275_v22 = vld [vmem:[%s1553_s1 + $0x70] sm:$0xff]  ;;  %v276_v23 = vld [vmem:[%s1553_s1 + $0x78] sm:$0xff]  ;;  %p1129_p12 = pnand %p1128_p6, %p1564_p11  ;;  %s1131_s17 = sshll.u32 %s1198_s13, 4  ;;  %s1132_s17 = int_to_ptr.vmem [resolvable:$false] %s1131_s17 }
  0x3e   : > { %v1031_v21 = vpack.c.bf16 %v274_v20, %v273_v19  ;;  %v1035_v24 = vpack.c.bf16 %v276_v23, %v275_v22  ;;  %v246_v25 = vld [vmem:[%s1341_s28 + $0x8] sm:$0xff]  ;;  %v247_v26 = vld [vmem:[%s1341_s28 + $0x10] sm:$0xff]  ;;  %v248_v27 = vld [vmem:[%s1341_s28 + $0x18] sm:$0xff]  ;;  %s1133_s26 = scalar_lea.vmem %s1132_s17, 4096  ;;  %p1134_p8 = scmp.lt.s32.totalorder %s1506_s7, %s1132_s17 }
  0x3f   : > { %v249_v28 = vld [vmem:[%s1341_s28 + $0x20] sm:$0xff]  ;;  %v250_v29 = vld [vmem:[%s1341_s28 + $0x28] sm:$0xff]  ;;  %v251_v30 = vld [vmem:[%s1341_s28 + $0x30] sm:$0xff]  ;;  %p1130_p13 = pneg %p1129_p12  ;;  %p1135_p10 = scmp.lt.s32.totalorder %s1133_s26, %s1127_s11 }
  0x40   : > { %1014 = vmatpush3.bf16.msra.mxu0 %v1011_v5  ;;  %v252_v31 = vld [vmem:[%s1341_s28 + $0x38] sm:$0xff]  ;;  %v253_v32 = vld [vmem:[%s1341_s28 + $0x40] sm:$0xff]  ;;  %v254_v33 = vld [vmem:[%s1341_s28 + $0x48] sm:$0xff] }
  0x41   : > { %1016 = vmatprep.subr.bf16.mxu0 %v1015_v8  ;;  %v255_v34 = vld [vmem:[%s1341_s28 + $0x50] sm:$0xff]  ;;  %v256_v35 = vld [vmem:[%s1341_s28 + $0x58] sm:$0xff]  ;;  %v257_v36 = vld [vmem:[%s1341_s28 + $0x60] sm:$0xff]  ;;  %p1136_p0 = por %p1135_p10, %p1134_p8 }
  0x42   : > { %v258_v37 = vld [vmem:[%s1341_s28 + $0x68] sm:$0xff]  ;;  %v259_v38 = vld [vmem:[%s1341_s28 + $0x70] sm:$0xff]  ;;  %v260_v39 = vld [vmem:[%s1341_s28 + $0x78] sm:$0xff] }
  0x43   : > { %v477_v40 = vld [vmem:[%s1555_s3] sm:$0xff]  ;;  %v478_v41 = vld [vmem:[%s1555_s3 + $0x8] sm:$0xff]  ;;  %v479_v43 = vld [vmem:[%s1555_s3 + $0x10] sm:$0xff]  ;;  %p1137_p2 = pnand %p1136_p0, %p1130_p13 }
  0x44   : > { %1018 = vmatpush3.bf16.msra.mxu0 %v1015_v8  ;;  %v1039_v42 = vpack.c.bf16 %v478_v41, %v477_v40  ;;  %v480_v44 = vld [vmem:[%s1555_s3 + $0x18] sm:$0xff]  ;;  %v1426_v46 = vld [vmem:[%s1554_s2] ss:$0 sm:$0xff] }
  0x45   : > { %1020 = vmatprep.subr.bf16.mxu0 %v1019_v12  ;;  %v1043_v45 = vpack.c.bf16 %v480_v44, %v479_v43 }
  0x46   : > { %1040 = vmatprep.subr.bf16.mxu1 %v1039_v42 }
  0x47   : > { %1042 = vmatpush3.bf16.msra.mxu1 %v1039_v42 }
  0x48   : > { %1022 = vmatpush3.bf16.msra.mxu0 %v1019_v12  ;;  %1044 = vmatprep.subr.bf16.mxu1 %v1043_v45 }
  0x49   : > { %1024 = vmatprep.subr.bf16.mxu0 %v1023_v15 }
  0x4b   : > { %1046 = vmatpush3.bf16.msra.mxu1 %v1043_v45 }
  0x4c   : > { %1026 = vmatpush3.bf16.msra.mxu0 %v1023_v15 }
  0x4d   : > { %1028 = vmatprep.subr.bf16.mxu0 %v1027_v18 }
  0x50   : > { %1030 = vmatpush3.bf16.msra.mxu0 %v1027_v18 }
  0x51   : > { %1032 = vmatprep.subr.bf16.mxu0 %v1031_v21 }
  0x54   : > { %1034 = vmatpush3.bf16.msra.mxu0 %v1031_v21 }
  0x55   : > { %1036 = vmatprep.subr.bf16.mxu0 %v1035_v24 }
  0x58   : > { %1038 = vmatpush3.bf16.msra.mxu0 %v1035_v24 }
  0x5b   : > { %952 = vmatmul.mubr.f32.vlgmr.msra.gmra.mrb[0].mxu0 %v246_v25 }
  0x5c   : > { %954 = vmatprep.mubr.f32.mxu0 %v247_v26 }
  0x5f   : > { %955 = vmatmul.mubr.f32.gmra.mrb[2].mxu0 %v248_v27 }
  0x60   : > { %957 = vmatprep.mubr.f32.mxu0 %v249_v28 }
  0x63   : > { %958 = vmatmul.mubr.f32.gmra.mrb[4].mxu0 %v250_v29 }
  0x64   : > { %960 = vmatprep.mubr.f32.mxu0 %v251_v30 }
  0x67   : > { %961 = vmatmul.mubr.f32.gmra.mrb[6].mxu0 %v252_v31 }
  0x68   : > { %963 = vmatprep.mubr.f32.mxu0 %v253_v32 }
  0x6b   : > { %964 = vmatmul.mubr.f32.gmra.mrb[8].mxu0 %v254_v33 }
  0x6c   : > { %966 = vmatprep.mubr.f32.mxu0 %v255_v34 }
  0x6f   : > { %967 = vmatmul.mubr.f32.gmra.mrb[10].mxu0 %v256_v35 }
  0x70   : > { %969 = vmatprep.mubr.f32.mxu0 %v257_v36 }
  0x73   : > { %970 = vmatmul.mubr.f32.gmra.mrb[12].mxu0 %v258_v37 }
  0x74   : > { %972 = vmatprep.mubr.f32.mxu0 %v259_v38 }
  0x77   : > { %973 = vmatmul.mubr.f32.gmra.mrb[14].mxu0 %v260_v39 }
 0x12e   : > { %v953_v47 = vpop.f32.mrb[0].mxu0 }
 0x12f   : > { %v356_v48 = vadd.f32 %v953_v47, %v1426_v46  ;;  %v350_v49 = vpop.f32.mrb[1].mxu0 }
 0x130   : > { %v351_v50 = vadd.f32 %v1426_v46, %v350_v49 }
 0x131   : > { %v446_v51 = vmul.f32 0.01, %v356_v48  ;;  %vm430_vm0 = vcmp.gt.f32.partialorder %v356_v48, 0.0 }
 0x132   : > { %v956_v52 = vpop.f32.mrb[2].mxu0  ;;  %vm429_vm1 = vcmp.gt.f32.partialorder %v351_v50, 0.0  ;;  %v445_v53 = vmul.f32 0.01, %v351_v50 }
 0x133   : > { %v366_v54 = vadd.f32 %v956_v52, %v1426_v46  ;;  %v360_v55 = vpop.f32.mrb[3].mxu0  ;;  %v462_v59 = vsel %vm430_vm0, %v356_v48, %v446_v51 }
 0x134   : > { %v361_v56 = vadd.f32 %v1426_v46, %v360_v55  ;;  %v461_v57 = vsel %vm429_vm1, %v351_v50, %v445_v53 }
 0x135   : > { %v448_v58 = vmul.f32 0.01, %v366_v54  ;;  %983 = vmatprep.mubr.msk.f32.mxu1 %vm488_vm2, %v461_v57  ;;  %vm432_vm3 = vcmp.gt.f32.partialorder %v366_v54, 0.0 }
 0x136   : > { %vm431_vm4 = vcmp.gt.f32.partialorder %v361_v56, 0.0  ;;  %v447_v60 = vmul.f32 0.01, %v361_v56  ;;  %v959_v61 = vpop.f32.mrb[4].mxu0  ;;  %984 = vmatmul.mubr.msk.f32.vlgmr.msra.gmra.mrb[0].mxu1 %vm488_vm2, %v462_v59 }
 0x137   : > { %v376_v62 = vadd.f32 %v959_v61, %v1426_v46  ;;  %v370_v63 = vpop.f32.mrb[5].mxu0  ;;  %v464_v3 = vsel %vm432_vm3, %v366_v54, %v448_v58 }
 0x138   : > { %v371_v0 = vadd.f32 %v1426_v46, %v370_v63  ;;  %v463_v1 = vsel %vm431_vm4, %v361_v56, %v447_v60 }
 0x139   : > { %v450_v2 = vmul.f32 0.01, %v376_v62  ;;  %986 = vmatprep.mubr.msk.f32.mxu1 %vm488_vm2, %v463_v1  ;;  %vm434_vm5 = vcmp.gt.f32.partialorder %v376_v62, 0.0 }
 0x13a   : > { %vm433_vm6 = vcmp.gt.f32.partialorder %v371_v0, 0.0  ;;  %v449_v4 = vmul.f32 0.01, %v371_v0  ;;  %v962_v5 = vpop.f32.mrb[6].mxu0  ;;  %987 = vmatmul.mubr.msk.f32.gmra.mrb[2].mxu1 %vm488_vm2, %v464_v3 }
 0x13b   : > { %v386_v6 = vadd.f32 %v962_v5, %v1426_v46  ;;  %v380_v7 = vpop.f32.mrb[7].mxu0  ;;  %v466_v11 = vsel %vm434_vm5, %v376_v62, %v450_v2 }
 0x13c   : > { %v381_v8 = vadd.f32 %v1426_v46, %v380_v7  ;;  %v465_v9 = vsel %vm433_vm6, %v371_v0, %v449_v4 }
 0x13d   : > { %v452_v10 = vmul.f32 0.01, %v386_v6  ;;  %989 = vmatprep.mubr.msk.f32.mxu1 %vm488_vm2, %v465_v9  ;;  %vm436_vm7 = vcmp.gt.f32.partialorder %v386_v6, 0.0 }
 0x13e   : > { %vm435_vm8 = vcmp.gt.f32.partialorder %v381_v8, 0.0  ;;  %v451_v12 = vmul.f32 0.01, %v381_v8  ;;  %v965_v13 = vpop.f32.mrb[8].mxu0  ;;  %990 = vmatmul.mubr.msk.f32.gmra.mrb[4].mxu1 %vm488_vm2, %v466_v11 }
 0x13f   : > { %v396_v14 = vadd.f32 %v965_v13, %v1426_v46  ;;  %v390_v15 = vpop.f32.mrb[9].mxu0  ;;  %v468_v19 = vsel %vm436_vm7, %v386_v6, %v452_v10 }
 0x140   : > { %v391_v16 = vadd.f32 %v1426_v46, %v390_v15  ;;  %v467_v17 = vsel %vm435_vm8, %v381_v8, %v451_v12 }
 0x141   : > { %v454_v18 = vmul.f32 0.01, %v396_v14  ;;  %992 = vmatprep.mubr.msk.f32.mxu1 %vm488_vm2, %v467_v17  ;;  %vm438_vm9 = vcmp.gt.f32.partialorder %v396_v14, 0.0 }
 0x142   : > { %vm437_vm10 = vcmp.gt.f32.partialorder %v391_v16, 0.0  ;;  %v453_v20 = vmul.f32 0.01, %v391_v16  ;;  %v968_v21 = vpop.f32.mrb[10].mxu0  ;;  %993 = vmatmul.mubr.msk.f32.gmra.mrb[6].mxu1 %vm488_vm2, %v468_v19 }
 0x143   : > { %v406_v22 = vadd.f32 %v968_v21, %v1426_v46  ;;  %v400_v23 = vpop.f32.mrb[11].mxu0  ;;  %v470_v27 = vsel %vm438_vm9, %v396_v14, %v454_v18 }
 0x144   : > { %v401_v24 = vadd.f32 %v1426_v46, %v400_v23  ;;  %v469_v25 = vsel %vm437_vm10, %v391_v16, %v453_v20 }
 0x145   : > { %v456_v26 = vmul.f32 0.01, %v406_v22  ;;  %995 = vmatprep.mubr.msk.f32.mxu1 %vm488_vm2, %v469_v25  ;;  %vm440_vm11 = vcmp.gt.f32.partialorder %v406_v22, 0.0 }
 0x146   : > { %vm439_vm12 = vcmp.gt.f32.partialorder %v401_v24, 0.0  ;;  %v455_v28 = vmul.f32 0.01, %v401_v24  ;;  %v971_v29 = vpop.f32.mrb[12].mxu0  ;;  %996 = vmatmul.mubr.msk.f32.gmra.mrb[8].mxu1 %vm488_vm2, %v470_v27 }
 0x147   : > { %v416_v30 = vadd.f32 %v971_v29, %v1426_v46  ;;  %v410_v31 = vpop.f32.mrb[13].mxu0  ;;  %v472_v35 = vsel %vm440_vm11, %v406_v22, %v456_v26 }
 0x148   : > { %v411_v32 = vadd.f32 %v1426_v46, %v410_v31  ;;  %v471_v33 = vsel %vm439_vm12, %v401_v24, %v455_v28 }
 0x149   : > { %v458_v34 = vmul.f32 0.01, %v416_v30  ;;  %998 = vmatprep.mubr.msk.f32.mxu1 %vm488_vm2, %v471_v33  ;;  %vm442_vm13 = vcmp.gt.f32.partialorder %v416_v30, 0.0 }
 0x14a   : > { %vm441_vm14 = vcmp.gt.f32.partialorder %v411_v32, 0.0  ;;  %v457_v36 = vmul.f32 0.01, %v411_v32  ;;  %v974_v37 = vpop.f32.mrb[14].mxu0  ;;  %999 = vmatmul.mubr.msk.f32.gmra.mrb[10].mxu1 %vm488_vm2, %v472_v35 }
 0x14b   : > { %v426_v38 = vadd.f32 %v974_v37, %v1426_v46  ;;  %v420_v39 = vpop.f32.mrb[15].mxu0  ;;  %v474_v43 = vsel %vm442_vm13, %v416_v30, %v458_v34 }
 0x14c   : > { %v421_v40 = vadd.f32 %v1426_v46, %v420_v39  ;;  %v473_v41 = vsel %vm441_vm14, %v411_v32, %v457_v36  ;;  %v1463_v46 = vld [vmem:[%s1556_s4] ss:$0 sm:$0xff] }
 0x14d   : > { %v460_v42 = vmul.f32 0.01, %v426_v38  ;;  %1001 = vmatprep.mubr.msk.f32.mxu1 %vm488_vm2, %v473_v41  ;;  %vm444_vm15 = vcmp.gt.f32.partialorder %v426_v38, 0.0 }
 0x14e   : > { %vm443_vm0 = vcmp.gt.f32.partialorder %v421_v40, 0.0  ;;  %v459_v44 = vmul.f32 0.01, %v421_v40  ;;  %1002 = vmatmul.mubr.msk.f32.gmra.mrb[12].mxu1 %vm488_vm2, %v474_v43 }
 0x14f   : > { %v476_v47 = vsel %vm444_vm15, %v426_v38, %v460_v42 }
 0x150   : > { %v475_v45 = vsel %vm443_vm0, %v421_v40, %v459_v44 }
 0x151   : > { %1004 = vmatprep.mubr.msk.f32.mxu1 %vm488_vm2, %v475_v45 }
 0x152   : > { %1005 = vmatmul.mubr.msk.f32.gmra.mrb[14].mxu1 %vm488_vm2, %v476_v47 }
 0x209   : > { %v985_v48 = vpop.f32.mrb[0].mxu1 }
 0x20a   : > { %v609_v49 = vadd.f32 %v985_v48, %v1463_v46  ;;  %v603_v50 = vpop.f32.mrb[1].mxu1 }
 0x20b   : > { %v604_v51 = vadd.f32 %v1463_v46, %v603_v50 }
 0x20c   : > { %vm683_vm1 = vcmp.gt.f32.partialorder %v609_v49, 0.0  ;;  %v699_v52 = vmul.f32 0.01, %v609_v49 }
 0x20d   : > { %vm682_vm3 = vcmp.gt.f32.partialorder %v604_v51, 0.0  ;;  %v698_v53 = vmul.f32 0.01, %v604_v51  ;;  %v988_v54 = vpop.f32.mrb[2].mxu1 }
 0x20e   : > { %v715_v55 = vsel %vm683_vm1, %v609_v49, %v699_v52  ;;  %v619_v56 = vadd.f32 %v988_v54, %v1463_v46  ;;  %v613_v57 = vpop.f32.mrb[3].mxu1 }
 0x20f   : > { %731 = vst [vmem:[%s1470_s8 + $0x8] sm:$0xff] %v715_v55  ;;  %v714_v58 = vsel %vm682_vm3, %v604_v51, %v698_v53  ;;  %v614_v59 = vadd.f32 %v1463_v46, %v613_v57 }
 0x210   : > { %730 = vst [vmem:[%s1470_s8] sm:$0xff] %v714_v58  ;;  %vm685_vm2 = vcmp.gt.f32.partialorder %v619_v56, 0.0  ;;  %v701_v60 = vmul.f32 0.01, %v619_v56 }
 0x211   : > { %vm684_vm4 = vcmp.gt.f32.partialorder %v614_v59, 0.0  ;;  %v700_v61 = vmul.f32 0.01, %v614_v59  ;;  %v991_v62 = vpop.f32.mrb[4].mxu1 }
 0x212   : > { %v717_v63 = vsel %vm685_vm2, %v619_v56, %v701_v60  ;;  %v629_v0 = vadd.f32 %v991_v62, %v1463_v46  ;;  %v623_v1 = vpop.f32.mrb[5].mxu1 }
 0x213   : > { %733 = vst [vmem:[%s1470_s8 + $0x18] sm:$0xff] %v717_v63  ;;  %v716_v2 = vsel %vm684_vm4, %v614_v59, %v700_v61  ;;  %v624_v3 = vadd.f32 %v1463_v46, %v623_v1 }
 0x214   : > { %732 = vst [vmem:[%s1470_s8 + $0x10] sm:$0xff] %v716_v2  ;;  %vm687_vm5 = vcmp.gt.f32.partialorder %v629_v0, 0.0  ;;  %v703_v4 = vmul.f32 0.01, %v629_v0 }
 0x215   : > { %vm686_vm6 = vcmp.gt.f32.partialorder %v624_v3, 0.0  ;;  %v702_v5 = vmul.f32 0.01, %v624_v3  ;;  %v994_v6 = vpop.f32.mrb[6].mxu1 }
 0x216   : > { %v719_v7 = vsel %vm687_vm5, %v629_v0, %v703_v4  ;;  %v639_v8 = vadd.f32 %v994_v6, %v1463_v46  ;;  %v633_v9 = vpop.f32.mrb[7].mxu1 }
 0x217   : > { %735 = vst [vmem:[%s1470_s8 + $0x28] sm:$0xff] %v719_v7  ;;  %v718_v10 = vsel %vm686_vm6, %v624_v3, %v702_v5  ;;  %v634_v11 = vadd.f32 %v1463_v46, %v633_v9 }
 0x218   : > { %734 = vst [vmem:[%s1470_s8 + $0x20] sm:$0xff] %v718_v10  ;;  %vm689_vm7 = vcmp.gt.f32.partialorder %v639_v8, 0.0  ;;  %v705_v12 = vmul.f32 0.01, %v639_v8 }
 0x219   : > { %vm688_vm8 = vcmp.gt.f32.partialorder %v634_v11, 0.0  ;;  %v704_v13 = vmul.f32 0.01, %v634_v11  ;;  %v997_v14 = vpop.f32.mrb[8].mxu1 }
 0x21a   : > { %v721_v15 = vsel %vm689_vm7, %v639_v8, %v705_v12  ;;  %v649_v16 = vadd.f32 %v997_v14, %v1463_v46  ;;  %v643_v17 = vpop.f32.mrb[9].mxu1 }
 0x21b   : > { %737 = vst [vmem:[%s1470_s8 + $0x38] sm:$0xff] %v721_v15  ;;  %v720_v18 = vsel %vm688_vm8, %v634_v11, %v704_v13  ;;  %v644_v19 = vadd.f32 %v1463_v46, %v643_v17 }
 0x21c   : > { %736 = vst [vmem:[%s1470_s8 + $0x30] sm:$0xff] %v720_v18  ;;  %vm691_vm9 = vcmp.gt.f32.partialorder %v649_v16, 0.0  ;;  %v707_v20 = vmul.f32 0.01, %v649_v16 }
 0x21d   : > { %vm690_vm10 = vcmp.gt.f32.partialorder %v644_v19, 0.0  ;;  %v706_v21 = vmul.f32 0.01, %v644_v19  ;;  %v1000_v22 = vpop.f32.mrb[10].mxu1 }
 0x21e   : > { %v723_v23 = vsel %vm691_vm9, %v649_v16, %v707_v20  ;;  %v659_v24 = vadd.f32 %v1000_v22, %v1463_v46  ;;  %v653_v25 = vpop.f32.mrb[11].mxu1 }
 0x21f   : > { %739 = vst [vmem:[%s1470_s8 + $0x48] sm:$0xff] %v723_v23  ;;  %v722_v26 = vsel %vm690_vm10, %v644_v19, %v706_v21  ;;  %v654_v27 = vadd.f32 %v1463_v46, %v653_v25 }
 0x220   : > { %738 = vst [vmem:[%s1470_s8 + $0x40] sm:$0xff] %v722_v26  ;;  %vm693_vm11 = vcmp.gt.f32.partialorder %v659_v24, 0.0  ;;  %v709_v28 = vmul.f32 0.01, %v659_v24 }
 0x221   : > { %vm692_vm12 = vcmp.gt.f32.partialorder %v654_v27, 0.0  ;;  %v708_v29 = vmul.f32 0.01, %v654_v27  ;;  %v1003_v30 = vpop.f32.mrb[12].mxu1 }
 0x222   : > { %v725_v31 = vsel %vm693_vm11, %v659_v24, %v709_v28  ;;  %v669_v32 = vadd.f32 %v1003_v30, %v1463_v46  ;;  %v663_v33 = vpop.f32.mrb[13].mxu1 }
 0x223   : > { %741 = vst [vmem:[%s1470_s8 + $0x58] sm:$0xff] %v725_v31  ;;  %v724_v34 = vsel %vm692_vm12, %v654_v27, %v708_v29  ;;  %v664_v35 = vadd.f32 %v1463_v46, %v663_v33 }
 0x224   : > { %740 = vst [vmem:[%s1470_s8 + $0x50] sm:$0xff] %v724_v34  ;;  %vm695_vm13 = vcmp.gt.f32.partialorder %v669_v32, 0.0  ;;  %v711_v36 = vmul.f32 0.01, %v669_v32 }
 0x225   : > { %vm694_vm14 = vcmp.gt.f32.partialorder %v664_v35, 0.0  ;;  %v710_v37 = vmul.f32 0.01, %v664_v35  ;;  %v1006_v38 = vpop.f32.mrb[14].mxu1 }
 0x226   : > { %v727_v39 = vsel %vm695_vm13, %v669_v32, %v711_v36  ;;  %v679_v40 = vadd.f32 %v1006_v38, %v1463_v46  ;;  %v673_v41 = vpop.f32.mrb[15].mxu1 }
 0x227   : > { %743 = vst [vmem:[%s1470_s8 + $0x68] sm:$0xff] %v727_v39  ;;  %v726_v42 = vsel %vm694_vm14, %v664_v35, %v710_v37  ;;  %v674_v43 = vadd.f32 %v1463_v46, %v673_v41 }
 0x228   : > { %742 = vst [vmem:[%s1470_s8 + $0x60] sm:$0xff] %v726_v42  ;;  %vm697_vm15 = vcmp.gt.f32.partialorder %v679_v40, 0.0  ;;  %v713_v44 = vmul.f32 0.01, %v679_v40 }
 0x229   : > { %vm696_vm0 = vcmp.gt.f32.partialorder %v674_v43, 0.0  ;;  %v712_v45 = vmul.f32 0.01, %v674_v43 }
 0x22a   : > { %v729_v47 = vsel %vm697_vm15, %v679_v40, %v713_v44 }
 0x22b   : > { %745 = vst [vmem:[%s1470_s8 + $0x78] sm:$0xff] %v729_v47  ;;  %v728_v48 = vsel %vm696_vm0, %v674_v43, %v712_v45 }
 0x22c   : > { %744 = vst [vmem:[%s1470_s8 + $0x70] sm:$0xff] %v728_v48 }
 0x22d   : > { %1140 = shalt.err (!%p1137_p2)
}
 0x22e   : > { %s1141_s12 = scalar_lea.hbm %s1504_s29, 2048  ;;  %s1145_s15 = scalar_lea.hbm %s1557_s5, 4096 }
 0x22f   : > { %p1142_p4 = scmp.ne.s32.totalorder %s1504_s29, %s1141_s12  ;;  %p1146_p9 = scmp.lt.u32.totalorder %s1504_s29, %s1557_s5 }
 0x230   : > { %p1147_p1 = scmp.lt.u32.totalorder %s1145_s15, %s1141_s12  ;;  %p1149_p6 = scmp.lt.u32.totalorder %s1141_s12, %s1504_s29 }
 0x231   : > { %p1143_p5 = pnand %p1142_p4, %p1564_p11 }
 0x232   : > { %p1148_p3 = por %p1147_p1, %p1146_p9 }
 0x233   : > { %p1144_p7 = pneg %p1143_p5 }
 0x234   : > { %p1150_p12 = por %p1149_p6, %p1148_p3 }
 0x236   : > { %p1151_p13 = pnand %p1150_p12, %p1144_p7 }
 0x238   : > { %1154 = shalt.err (!%p1151_p13)
}
 0x239   : > { %s1199_s25 = smov 128   ;;  %s1200_s9 = smov 8  }
 0x23a   : > { %1049 = dma.vmem_to_hbm [thread:$0]  (%p1564_p11), %s1506_s7, 2048, %s1504_s29, %s747_s22, %s1199_s25, %s1199_s25, %s1200_s9  }
 0x23b PF: > { %s775_s10 = sand.u32 1, %s1181_s18   ;;  %p1565_p8 = scmp.ne.s32.totalorder %s1562_s6, 0 }
 0x23c   : > { %p1566_p10 = scmp.ge.s32.totalorder %s1193_s21, 2  ;;  %s776_s11 = scalar_lea.sflag [#allocation4], %s775_s10 }
 0x23e   : > { %p1056_p0 = pnand %p1566_p10, %p1565_p8 }
 0x240   : > { %1176 = dma.done.wait (!%p1056_p0), %s776_s11, 2048  }
 0x241   : > { %1178 = vsyncadd (!%p1056_p0), %s776_s11, 4294965248  ;;  %p18_p2 = scmp.ge.s32.totalorder %s1256_s24, 4   ;;  %s1567_s18 = smov %s1185_s19 }
 0x242   : > { %s1568_s19 = smov %s1189_s20  ;;  %s1569_s20 = smov %s1268_s27 }
 0x243   : > { %s1570_s21 = smov %s1256_s24  ;;  %20 = sbr.rel (!%p18_p2) target bundleno = 5 (0x5), region = 85 }
 0x24a   :  { %781 = vsyncpa [#allocation3], 1 }
 0x24b   :  { %783 = vsyncpa [#allocation3 + $0x1], 1 }
 0x24c   :  { %784 = vsyncpa [#allocation4], 1 }
 0x24d   :  { %786 = vsyncpa [#allocation4 + $0x1], 1 }

</bundles_post_ra>
